<compile_context>
chip_gen: v5e
topology: v5e:2x2
jax: 0.10.0
libtpu: 0.0.40
codegen_flags: <defaults>
</compile_context>

<pallas_src>
import jax
import jax.numpy as jnp
from jax.experimental import pallas as pl
from jax.experimental.pallas import tpu as pltpu


CIN = 2
COUT = 4
LANE = 128          # TPU lane width: output last dim stays a multiple of this
DEFAULT_TL = 512    # length tile: big enough to approach HBM roofline, small
                    # enough to double-buffer comfortably inside v7x's 64 MiB VMEM


def conv1d_k1_kernel(x_ref, w_ref, o_ref):
    # x_ref: (B, CIN, TL) VMEM (lane-dense), w_ref: (COUT, CIN) SMEM scalars,
    # o_ref: (B, COUT, TL) VMEM
    x = x_ref[...]                       # one VMEM tile load
    x0 = x[:, 0, :]                      # (B, TL)
    x1 = x[:, 1, :]                      # (B, TL)
    # Unrolled VPU FMAs with SMEM scalar weights; memory-bound op, so this
    # compute hides entirely under the pipelined DMA.
    for o in range(COUT):
        o_ref[:, o, :] = w_ref[o, 0] * x0 + w_ref[o, 1] * x1


def conv1d_k1(x, weight, *, tl=DEFAULT_TL):
    """x: (B, CIN, L) float32; weight: (COUT, CIN, 1) float32 (PyTorch layout)."""
    B, cin, L = x.shape
    assert cin == CIN and weight.shape == (COUT, CIN, 1)
    w2d = weight[..., 0].astype(jnp.float32)        # (COUT, CIN), k=1 tap squeezed

    # Lane-dense tiling of the length axis (last dim multiple of 128).
    l_dense = pl.cdiv(L, LANE) * LANE
    tl = min(tl, l_dense)
    l_pad = pl.cdiv(L, tl) * tl
    if l_pad != L:
        x = jnp.pad(x, ((0, 0), (0, 0), (0, l_pad - L)))

    grid = (l_pad // tl,)

    out = pl.pallas_call(
        conv1d_k1_kernel,
        out_shape=jax.ShapeDtypeStruct((B, COUT, l_pad), x.dtype),
        grid=grid,
        in_specs=[
            pl.BlockSpec((B, CIN, tl), lambda i: (0, 0, i)),
            pl.BlockSpec(memory_space=pltpu.MemorySpace.SMEM),  # 8 scalar weights
        ],
        out_specs=pl.BlockSpec((B, COUT, tl), lambda i: (0, 0, i)),
        compiler_params=pltpu.CompilerParams(
            dimension_semantics=("parallel",),   # shard L-tiles across TCs (v7x)
        ),
    )(x, w2d)

    return out[..., :L]


def make_weight():
    # Deterministic init matching TestConv1d.init_weights():
    # weight[o, c, 0] = 2.0 * (o + 1) for all c
    return jnp.array(
        [
            [[2.0], [2.0]],
            [[4.0], [4.0]],
            [[6.0], [6.0]],
            [[8.0], [8.0]],
        ],
        dtype=jnp.float32,
    )  # (out_channels=4, in_channels=2, kernel_size=1)


if __name__ == "__main__":
    key0, key1 = jax.random.split(jax.random.PRNGKey(0))
    weight = make_weight()
    w2d = weight[..., 0]

    # Small shapes consistent with the module: (batch=2, in_channels=2, length=16)
    B, L = 2, 16
    x = jax.random.normal(key0, (B, CIN, L), dtype=jnp.float32)
    out = jax.block_until_ready(conv1d_k1(x, weight))
    ref = jnp.einsum("oc,bcl->bol", w2d, x)
    assert out.shape == (B, COUT, L), out.shape
    assert jnp.allclose(out, ref, atol=1e-5, rtol=1e-5)

    # Exercise the multi-block (grid > 1) pipelined path with padding.
    L2 = 640
    x2 = jax.random.normal(key1, (B, CIN, L2), dtype=jnp.float32)
    out2 = jax.block_until_ready(conv1d_k1(x2, weight))
    ref2 = jnp.einsum("oc,bcl->bol", w2d, x2)
    assert out2.shape == (B, COUT, L2), out2.shape
    assert jnp.allclose(out2, ref2, atol=1e-5, rtol=1e-5)

    print("KERNEL_OK")
</pallas_src>

<mosaic_0001>
module attributes {stable_mosaic.version = 11 : i64} {
  func.func @conv1d_k1_kernel(%arg0: i32, %arg1: memref<2x2x128xf32, #tpu.memory_space<vmem>>, %arg2: memref<4x2xf32, #tpu.memory_space<smem>>, %arg3: memref<2x4x128xf32, #tpu.memory_space<vmem>>) attributes {dimension_semantics = [#tpu.dimension_semantics<parallel>], iteration_bounds = array<i64: 1>, scalar_prefetch = 0 : i64, scratch_operands = 0 : i64, tpu.core_type = #tpu.core_type<tc>, window_params = [{transform_indices = @transform_0, window_bounds = array<i64: 2, 2, 128>}, {transform_indices = @transform_1, window_bounds = array<i64: 4, 2>}, {transform_indices = @transform_2, window_bounds = array<i64: 2, 4, 128>}]} {
    %c0 = arith.constant 0 : index
    %c0_0 = arith.constant 0 : index
    %c0_1 = arith.constant 0 : index
    %0 = vector.load %arg1[%c0, %c0_0, %c0_1] : memref<2x2x128xf32, #tpu.memory_space<vmem>>, vector<2x2x128xf32>
    %1 = vector.extract_strided_slice %0 {offsets = [0, 0, 0], sizes = [2, 1, 128], strides = [1, 1, 1]} : vector<2x2x128xf32> to vector<2x1x128xf32>
    %2 = vector.shape_cast %1 : vector<2x1x128xf32> to vector<2x128xf32>
    %3 = vector.extract_strided_slice %0 {offsets = [0, 1, 0], sizes = [2, 1, 128], strides = [1, 1, 1]} : vector<2x2x128xf32> to vector<2x1x128xf32>
    %4 = vector.shape_cast %3 : vector<2x1x128xf32> to vector<2x128xf32>
    %c0_2 = arith.constant 0 : index
    %c0_3 = arith.constant 0 : index
    %5 = memref.load %arg2[%c0_2, %c0_3] : memref<4x2xf32, #tpu.memory_space<smem>>
    %6 = vector.broadcast %5 : f32 to vector<2x128xf32>
    %7 = arith.mulf %6, %2 : vector<2x128xf32>
    %c0_4 = arith.constant 0 : index
    %c1 = arith.constant 1 : index
    %8 = memref.load %arg2[%c0_4, %c1] : memref<4x2xf32, #tpu.memory_space<smem>>
    %9 = vector.broadcast %8 : f32 to vector<2x128xf32>
    %10 = arith.mulf %9, %4 : vector<2x128xf32>
    %11 = arith.addf %7, %10 : vector<2x128xf32>
    %c0_5 = arith.constant 0 : index
    %c0_6 = arith.constant 0 : index
    %c0_7 = arith.constant 0 : index
    %12 = vector.load %arg3[%c0_5, %c0_6, %c0_7] : memref<2x4x128xf32, #tpu.memory_space<vmem>>, vector<2x1x128xf32>
    %13 = vector.shape_cast %12 : vector<2x1x128xf32> to vector<2x128xf32>
    %14 = vector.shape_cast %11 : vector<2x128xf32> to vector<2x1x128xf32>
    tpu.vector_store %arg3[%c0_5, %c0_6, %c0_7], %14 {strides = array<i32>} : memref<2x4x128xf32, #tpu.memory_space<vmem>>, vector<2x1x128xf32>,
    %c1_8 = arith.constant 1 : index
    %c0_9 = arith.constant 0 : index
    %15 = memref.load %arg2[%c1_8, %c0_9] : memref<4x2xf32, #tpu.memory_space<smem>>
    %16 = vector.broadcast %15 : f32 to vector<2x128xf32>
    %17 = arith.mulf %16, %2 : vector<2x128xf32>
    %c1_10 = arith.constant 1 : index
    %c1_11 = arith.constant 1 : index
    %18 = memref.load %arg2[%c1_10, %c1_11] : memref<4x2xf32, #tpu.memory_space<smem>>
    %19 = vector.broadcast %18 : f32 to vector<2x128xf32>
    %20 = arith.mulf %19, %4 : vector<2x128xf32>
    %21 = arith.addf %17, %20 : vector<2x128xf32>
    %c0_12 = arith.constant 0 : index
    %c1_13 = arith.constant 1 : index
    %c0_14 = arith.constant 0 : index
    %22 = vector.load %arg3[%c0_12, %c1_13, %c0_14] : memref<2x4x128xf32, #tpu.memory_space<vmem>>, vector<2x1x128xf32>
    %23 = vector.shape_cast %22 : vector<2x1x128xf32> to vector<2x128xf32>
    %24 = vector.shape_cast %21 : vector<2x128xf32> to vector<2x1x128xf32>
    tpu.vector_store %arg3[%c0_12, %c1_13, %c0_14], %24 {strides = array<i32>} : memref<2x4x128xf32, #tpu.memory_space<vmem>>, vector<2x1x128xf32>,
    %c2 = arith.constant 2 : index
    %c0_15 = arith.constant 0 : index
    %25 = memref.load %arg2[%c2, %c0_15] : memref<4x2xf32, #tpu.memory_space<smem>>
    %26 = vector.broadcast %25 : f32 to vector<2x128xf32>
    %27 = arith.mulf %26, %2 : vector<2x128xf32>
    %c2_16 = arith.constant 2 : index
    %c1_17 = arith.constant 1 : index
    %28 = memref.load %arg2[%c2_16, %c1_17] : memref<4x2xf32, #tpu.memory_space<smem>>
    %29 = vector.broadcast %28 : f32 to vector<2x128xf32>
    %30 = arith.mulf %29, %4 : vector<2x128xf32>
    %31 = arith.addf %27, %30 : vector<2x128xf32>
    %c0_18 = arith.constant 0 : index
    %c2_19 = arith.constant 2 : index
    %c0_20 = arith.constant 0 : index
    %32 = vector.load %arg3[%c0_18, %c2_19, %c0_20] : memref<2x4x128xf32, #tpu.memory_space<vmem>>, vector<2x1x128xf32>
    %33 = vector.shape_cast %32 : vector<2x1x128xf32> to vector<2x128xf32>
    %34 = vector.shape_cast %31 : vector<2x128xf32> to vector<2x1x128xf32>
    tpu.vector_store %arg3[%c0_18, %c2_19, %c0_20], %34 {strides = array<i32>} : memref<2x4x128xf32, #tpu.memory_space<vmem>>, vector<2x1x128xf32>,
    %c3 = arith.constant 3 : index
    %c0_21 = arith.constant 0 : index
    %35 = memref.load %arg2[%c3, %c0_21] : memref<4x2xf32, #tpu.memory_space<smem>>
    %36 = vector.broadcast %35 : f32 to vector<2x128xf32>
    %37 = arith.mulf %36, %2 : vector<2x128xf32>
    %c3_22 = arith.constant 3 : index
    %c1_23 = arith.constant 1 : index
    %38 = memref.load %arg2[%c3_22, %c1_23] : memref<4x2xf32, #tpu.memory_space<smem>>
    %39 = vector.broadcast %38 : f32 to vector<2x128xf32>
    %40 = arith.mulf %39, %4 : vector<2x128xf32>
    %41 = arith.addf %37, %40 : vector<2x128xf32>
    %c0_24 = arith.constant 0 : index
    %c3_25 = arith.constant 3 : index
    %c0_26 = arith.constant 0 : index
    %42 = vector.load %arg3[%c0_24, %c3_25, %c0_26] : memref<2x4x128xf32, #tpu.memory_space<vmem>>, vector<2x1x128xf32>
    %43 = vector.shape_cast %42 : vector<2x1x128xf32> to vector<2x128xf32>
    %44 = vector.shape_cast %41 : vector<2x128xf32> to vector<2x1x128xf32>
    tpu.vector_store %arg3[%c0_24, %c3_25, %c0_26], %44 {strides = array<i32>} : memref<2x4x128xf32, #tpu.memory_space<vmem>>, vector<2x1x128xf32>,
    return
  }
  func.func @transform_0(%arg0: i32) -> (i32, i32, i32) {
    %c0_i32 = arith.constant 0 : i32
    %c0_i32_0 = arith.constant 0 : i32
    %c0_i32_1 = arith.constant 0 : i32
    return %c0_i32, %c0_i32_0, %arg0 : i32, i32, i32
  }
  func.func @transform_1(%arg0: i32) -> (i32, i32) {
    %c0_i32 = arith.constant 0 : i32
    %c0_i32_0 = arith.constant 0 : i32
    %c0_i32_1 = arith.constant 0 : i32
    return %c0_i32, %c0_i32_0 : i32, i32
  }
  func.func @transform_2(%arg0: i32) -> (i32, i32, i32) {
    %c0_i32 = arith.constant 0 : i32
    %c0_i32_0 = arith.constant 0 : i32
    %c0_i32_1 = arith.constant 0 : i32
    return %c0_i32, %c0_i32_0, %arg0 : i32, i32, i32
  }
}

</mosaic_0001>

<bundles_post_ra>
// kernel: tpu_custom_call.1
= control target key start
LH: loop header
LB: loop body
LE: loop exit
PB: predicated region body
PF: predicated region fallthrough
CT: control target
= control target key end

     0   :  { %7 = vsyncpa [#allocation4], 0  ;;  %s206_s0 = inlined_call_operand.vmem [shape: f32[2,2,128], index: 0, kind: input, shape index: {}]   ;;  %s207_s1 = inlined_call_operand.vmem [shape: f32[4,2], index: 1, kind: input, shape index: {}]   ;;  %s208_s2 = inlined_call_operand.hbm [shape: f32[2,4,128], index: 2, kind: output, shape index: {}]  }
   0x1   :  { %8 = vsyncpa [#allocation3], 0  ;;  %s16_s11 = sshll.u32 %s207_s1, 4  ;;  %s169_s12 = smov [#allocation2]   ;;  %s17_s11 = int_to_ptr.vmem [resolvable:$true] %s16_s11 }
   0x2   :  { %19 = dma.vmem_to_smem %s17_s11, 64, %s169_s12, [#allocation4]  }
   0x3   :  { %165 = dma.done.wait [#allocation4], 64  }
   0x4   :  { %166 = vsyncadd [#allocation4], 4294967232 }
   0x5   :  { %24 = sfence }
   0x6   :  { %s27_s13 = sld [smem:[#allocation2]]  ;;  %v25_v0 = vld [vmem:[%s206_s0] sm:$0x3]  ;;  %v26_v1 = vld [vmem:[%s206_s0 + $0x2] sm:$0x3]  ;;  %s170_s0 = smov [#allocation5]  }
   0x7   :  { %s118_s14 = sld [smem:[#allocation2 + $0x1]]  ;;  %s103_s24 = sshll.u32 %s170_s0, 4  ;;  %s104_s24 = int_to_ptr.vmem [resolvable:$true] %s103_s24 }
   0x8   :  { %s119_s15 = sld [smem:[#allocation2 + $0x80]]  ;;  %s105_s27 = sshll.u32 %s208_s2, 4  ;;  %s106_s27 = int_to_ptr.hbm [resolvable:$true] %s105_s27 }
   0x9   :  { %s120_s16 = sld [smem:[#allocation2 + $0x81]]  ;;  %s171_s28 = smov 64  }
   0xa   :  { %s121_s17 = sld [smem:[#allocation2 + $0x100]]  ;;  %s172_s29 = smov 4  }
   0xb   :  { %s122_s1 = sld [smem:[#allocation2 + $0x101]] }
   0xc   :  { %v28_v2 = vstv %s27_s13  ;;  %s197_s22 = sld [smem:[#allocation2 + $0x180]] }
   0xd   :  { %v29_v3 = vmul.f32 %v28_v2, %v25_v0  ;;  %v32_v4 = vstv %s118_s14  ;;  %s199_s23 = sld [smem:[#allocation2 + $0x181]]  ;;  %v30_v6 = vmul.f32 %v28_v2, %v26_v1 }
   0xe   :  { %v33_v5 = vmul.f32 %v32_v4, %v25_v0  ;;  %v34_v7 = vmul.f32 %v32_v4, %v26_v1  ;;  %v46_v8 = vstv %s119_s15 }
   0xf   :  { %v47_v9 = vmul.f32 %v46_v8, %v25_v0  ;;  %v50_v10 = vstv %s120_s16  ;;  %v48_v11 = vmul.f32 %v46_v8, %v26_v1 }
  0x10   :  { %v37_v12 = vrot.slane %v33_v5, 1  ;;  %v38_v13 = vrot.slane %v34_v7, 1  ;;  %v51_v14 = vmul.f32 %v50_v10, %v25_v0  ;;  %v52_v15 = vmul.f32 %v50_v10, %v26_v1 }
  0x11   :  { %v64_v16 = vstv %s121_s17  ;;  %v68_v17 = vstv %s122_s1 }
  0x12   :  { %v41_v18 = vadd.f32 %v37_v12, %v29_v3  ;;  %v42_v19 = vadd.f32 %v38_v13, %v30_v6  ;;  %v55_v20 = vrot.slane %v51_v14, 1  ;;  %v56_v21 = vrot.slane %v52_v15, 1 }
  0x13   :  { %v65_v22 = vmul.f32 %v64_v16, %v25_v0  ;;  %v69_v23 = vmul.f32 %v68_v17, %v25_v0  ;;  %v66_v24 = vmul.f32 %v64_v16, %v26_v1  ;;  %v70_v25 = vmul.f32 %v68_v17, %v26_v1 }
  0x14   :  { %43 = vst [vmem:[#allocation5] sm:$0x1] %v41_v18  ;;  %v59_v26 = vadd.f32 %v55_v20, %v47_v9  ;;  %v60_v27 = vadd.f32 %v56_v21, %v48_v11  ;;  %v82_v28 = vstv %s197_s22  ;;  %v86_v29 = vstv %s199_s23 }
  0x15   :  { %44 = vst [vmem:[#allocation5 + $0x4] sm:$0x1] %v42_v19  ;;  %v73_v30 = vrot.slane %v69_v23, 1  ;;  %v74_v31 = vrot.slane %v70_v25, 1  ;;  %v83_v32 = vmul.f32 %v82_v28, %v25_v0  ;;  %v87_v33 = vmul.f32 %v86_v29, %v25_v0 }
  0x16   :  { %61 = vst [vmem:[#allocation5 + $0x1] sm:$0x1] %v59_v26  ;;  %v84_v34 = vmul.f32 %v82_v28, %v26_v1  ;;  %v88_v35 = vmul.f32 %v86_v29, %v26_v1 }
  0x17   :  { %62 = vst [vmem:[#allocation5 + $0x5] sm:$0x1] %v60_v27  ;;  %v77_v36 = vadd.f32 %v73_v30, %v65_v22  ;;  %v78_v37 = vadd.f32 %v74_v31, %v66_v24  ;;  %v91_v38 = vrot.slane %v87_v33, 1 }
  0x18   :  { %v92_v39 = vrot.slane %v88_v35, 1 }
  0x19   :  { %79 = vst [vmem:[#allocation5 + $0x2] sm:$0x1] %v77_v36  ;;  %v95_v40 = vadd.f32 %v91_v38, %v83_v32 }
  0x1a   :  { %80 = vst [vmem:[#allocation5 + $0x6] sm:$0x1] %v78_v37  ;;  %v96_v41 = vadd.f32 %v92_v39, %v84_v34 }
  0x1b   :  { %97 = vst [vmem:[#allocation5 + $0x3] sm:$0x1] %v95_v40 }
  0x1c   :  { %98 = vst [vmem:[#allocation5 + $0x7] sm:$0x1] %v96_v41 }
  0x1d   :  { %111 = dma.vmem_to_hbm [thread:$0]  %s104_s24, 128, %s106_s27, [#allocation3], %s171_s28, %s171_s28, %s172_s29  }
  0x1e   :  { %167 = dma.done.wait [#allocation3], 128  }
  0x1f   :  { %168 = vsyncadd [#allocation3], 4294967168 }
  0x20   :  { %116 = vsyncpa [#allocation3], 1 }
  0x21   :  { %117 = vsyncpa [#allocation4], 1 }

</bundles_post_ra>
